<compile_context>
chip_gen: v7x
topology: tpu7x:2x2x1
jax: 0.10.0
libtpu: 0.0.40
codegen_flags: <defaults>
</compile_context>

<pallas_src>
import math
import jax
import jax.numpy as jnp
from jax.experimental import pallas as pl
from jax.experimental.pallas import tpu as pltpu


def _round_up(x, m):
    return ((x + m - 1) // m) * m


def _vmem_capacity_bytes():
    # Generation-aware VMEM budget (64 MiB/TC on v7x, 128 MiB on v5e/v6e).
    try:
        cap = getattr(pltpu.get_tpu_info(), "vmem_capacity_bytes", None)
        if cap:
            return int(cap)
    except Exception:
        pass
    return 64 * 1024 * 1024  # conservative fallback (v7x size)


def _sample_params_kernel(wmu_ref, wsig_ref, wnz_ref, bmu_ref, bsig_ref, bnz_ref,
                          w_ref, b_ref):
    # Reparameterized posterior sample: w = mu + softplus(sig) * eps, computed
    # in f32 and stored in the matmul compute dtype.  eps == 0 everywhere
    # reproduces the sample_W=False / posterior-mean path.
    w_ref[...] = (wmu_ref[...] + jax.nn.softplus(wsig_ref[...]) * wnz_ref[...]
                  ).astype(w_ref.dtype)
    b_ref[...] = (bmu_ref[...] + jax.nn.softplus(bsig_ref[...]) * bnz_ref[...]
                  ).astype(b_ref.dtype)


def _make_conv_matmul_kernel(weight_resident, tk):
    def kernel(patch_ref, w_ref, b_ref, out_ref):
        k = pl.program_id(1)

        @pl.when(k == 0)
        def _init():
            # Bias folded into the accumulator init: this write touches every
            # element of the k-resident output block anyway, so the bias add
            # is free (no separate epilogue VPU pass, no acc scratch).
            out_ref[...] = jnp.broadcast_to(b_ref[...], out_ref.shape)

        if weight_resident:
            # Whole sampled weight lives in VMEM (constant block index);
            # slice the K rows for this reduction step.
            off = pl.multiple_of(k * tk, tk)
            w_tile = w_ref[pl.ds(off, tk), :]
        else:
            w_tile = w_ref[...]

        # bf16 (or f32) MXU inputs, f32 accumulation directly in out_ref.
        out_ref[...] += jnp.dot(patch_ref[...], w_tile,
                                preferred_element_type=jnp.float32)

    return kernel


def bnn_conv2d(x, w_mu, w_sig, b_mu, b_sig, w_noise, b_noise,
               stride, padding, *, tm=512, tk_max=1024,
               compute_dtype=jnp.bfloat16):
    """Equivalent of F.conv2d(x, mu + softplus(sig)*noise, bias, stride, padding)."""
    N, C, H, W = x.shape
    Cout, Cin, KH, KW = w_mu.shape
    assert Cin == C
    OH = (H + 2 * padding - KH) // stride + 1
    OW = (W + 2 * padding - KW) // stride + 1

    cbytes = jnp.dtype(compute_dtype).itemsize
    vmem_cap = _vmem_capacity_bytes()

    # --- im2col, feature-last (no full (M, K) transpose) ---
    xp = jnp.pad(x, ((0, 0), (0, 0), (padding, padding), (padding, padding)))
    x_nhwc = xp.transpose(0, 2, 3, 1)               # single small-input transpose
    cols = []
    for kh in range(KH):
        for kw in range(KW):
            cols.append(x_nhwc[:, kh:kh + stride * OH:stride,
                               kw:kw + stride * OW:stride, :])
    # (N, OH, OW, C, KH*KW): flat feature index = c*KH*KW + kh*KW + kw, which
    # matches torch's weight.reshape(Cout, Cin*KH*KW) ordering.
    patches = jnp.stack(cols, axis=4)
    patches = patches.reshape(N * OH * OW, C * KH * KW).astype(compute_dtype)
    M, K = patches.shape

    # --- TPU-friendly padding / tiling ---
    cout_pad = _round_up(Cout, 128)        # lane-dense output stores, MXU width

    tm = min(tm, _round_up(M, 8))          # don't over-pad tiny problems
    if M >= 512:                           # keep nm >= 2 so both v7x TCs get work
        tm = min(tm, _round_up((M + 1) // 2, 8))
    Mpad = _round_up(M, tm)

    if K <= tk_max:                        # small K: single reduction step
        tk, Kpad = K, K
    else:                                  # large K: tile the contraction
        tk = 512
        Kpad = _round_up(K, tk)
    nm, nk = Mpad // tm, Kpad // tk

    if Mpad != M or Kpad != K:
        patches = jnp.pad(patches, ((0, Mpad - M), (0, Kpad - K)))

    # Weight params as (Kpad, cout_pad), bias params as (1, cout_pad), all f32.
    # Zero pads => sampled pad entries are exactly zero (see header note).
    def as_kc(p):
        m = p.reshape(Cout, K).T.astype(jnp.float32)
        return jnp.pad(m, ((0, Kpad - K), (0, cout_pad - Cout)))

    def as_bias(p):
        return jnp.pad(p.astype(jnp.float32).reshape(1, Cout),
                       ((0, 0), (0, cout_pad - Cout)))

    # --- kernel 1: one-shot posterior sampling, tiled over Cout blocks ---
    ncb = cout_pad // 128
    samp_need = Kpad * 128 * (3 * 2 * 4 + 2 * cbytes) + 128 * (3 * 2 * 4 + 2 * 4)
    samp_limit = int(min(max(2 * samp_need, 4 << 20), (vmem_cap * 5) // 10))

    w_s, b_s = pl.pallas_call(
        _sample_params_kernel,
        out_shape=(jax.ShapeDtypeStruct((Kpad, cout_pad), compute_dtype),
                   jax.ShapeDtypeStruct((1, cout_pad), jnp.float32)),
        grid_spec=pltpu.PrefetchScalarGridSpec(
            num_scalar_prefetch=0,
            grid=(ncb,),
            in_specs=[pl.BlockSpec((Kpad, 128), lambda j: (0, j))] * 3
                    + [pl.BlockSpec((1, 128), lambda j: (0, j))] * 3,
            out_specs=[pl.BlockSpec((Kpad, 128), lambda j: (0, j)),
                       pl.BlockSpec((1, 128), lambda j: (0, j))],
        ),
        compiler_params=pltpu.CompilerParams(
            dimension_semantics=("parallel",),
            vmem_limit_bytes=samp_limit,
        ),
    )(as_kc(w_mu), as_kc(w_sig), as_kc(w_noise),
      as_bias(b_mu), as_bias(b_sig), as_bias(b_noise))

    # --- kernel 2: tiled (Mpad, Kpad) @ (Kpad, cout_pad) + bias ---
    # Keep the sampled weight VMEM-resident across M tiles when it fits the
    # per-generation budget (~1/8 of VMEM); with nk == 1 the constant block
    # index makes it resident anyway.
    weight_bytes = Kpad * cout_pad * cbytes
    weight_resident = (nk > 1) and (weight_bytes <= max(vmem_cap // 8, 4 << 20))

    if weight_resident:
        w_spec = pl.BlockSpec((Kpad, cout_pad), lambda i, k: (0, 0))
        w_buf_bytes = 2 * Kpad * cout_pad * cbytes
    else:
        w_spec = pl.BlockSpec((tk, cout_pad), lambda i, k: (k, 0))
        w_buf_bytes = 2 * tk * cout_pad * cbytes

    mm_need = (2 * tm * tk * cbytes          # patches (double-buffered)
               + w_buf_bytes                 # sampled weight
               + 2 * cout_pad * 4            # bias
               + 2 * tm * cout_pad * 4)      # f32 output / accumulator block
    mm_limit = int(min(max(int(1.5 * mm_need), 8 << 20), (vmem_cap * 6) // 10))

    out = pl.pallas_call(
        _make_conv_matmul_kernel(weight_resident, tk),
        out_shape=jax.ShapeDtypeStruct((Mpad, cout_pad), jnp.float32),
        grid_spec=pltpu.PrefetchScalarGridSpec(
            num_scalar_prefetch=0,
            grid=(nm, nk),                                      # reduction last
            in_specs=[
                pl.BlockSpec((tm, tk), lambda i, k: (i, k)),    # patches tile
                w_spec,                                         # sampled W
                pl.BlockSpec((1, cout_pad), lambda i, k: (0, 0)),  # sampled b
            ],
            out_specs=pl.BlockSpec((tm, cout_pad), lambda i, k: (i, 0)),
        ),
        compiler_params=pltpu.CompilerParams(
            dimension_semantics=("parallel", "arbitrary"),
            vmem_limit_bytes=mm_limit,
        ),
    )(patches, w_s, b_s)

    out = out[:M, :Cout].reshape(N, OH, OW, Cout).transpose(0, 3, 1, 2)
    return out


if __name__ == "__main__":
    key = jax.random.PRNGKey(0)
    in_features, out_features = 4, 8
    kernel = (3, 3)
    stride, padding = 1, 1
    N, Hs = 2, 16

    k_x, k_wmu, k_wn, k_bn = jax.random.split(key, 4)
    x = jax.random.normal(k_x, (N, in_features, Hs, Hs), jnp.float32)

    # Deterministic parameter init mirroring BNNConv.initialize_params().
    fan_out = out_features * kernel[0] * kernel[1] / (stride * stride)
    bound = math.sqrt(6.0 / fan_out)
    q_weight_mu = jax.random.uniform(
        k_wmu, (out_features, in_features, *kernel), jnp.float32, -bound, bound)
    q_weight_sig = jnp.full((out_features, in_features, *kernel), -4.0, jnp.float32)
    q_bias_mu = jnp.zeros((out_features,), jnp.float32)
    q_bias_sig = jnp.full((out_features,), -4.0, jnp.float32)

    def reference(w_noise, b_noise):
        w = q_weight_mu + jax.nn.softplus(q_weight_sig) * w_noise
        b = q_bias_mu + jax.nn.softplus(q_bias_sig) * b_noise
        return jax.lax.conv_general_dilated(
            x, w, window_strides=(stride, stride),
            padding=((padding, padding), (padding, padding)),
            dimension_numbers=("NCHW", "OIHW", "NCHW")) + b[None, :, None, None]

    # forward(x, sample_W=True): reparameterized sample (bf16 MXU inputs,
    # f32 accumulation — compare at bf16-level tolerance).
    w_noise = jax.random.normal(k_wn, q_weight_mu.shape, jnp.float32)
    b_noise = jax.random.normal(k_bn, q_bias_mu.shape, jnp.float32)
    out_s = bnn_conv2d(x, q_weight_mu, q_weight_sig, q_bias_mu, q_bias_sig,
                       w_noise, b_noise, stride, padding)
    out_s = jax.block_until_ready(out_s)
    assert out_s.shape == (N, out_features, Hs, Hs)
    assert jnp.allclose(out_s, reference(w_noise, b_noise), atol=2e-2, rtol=2e-2)

    # forward(x, sample_W=False): posterior mean (zero noise).
    zw, zb = jnp.zeros_like(q_weight_mu), jnp.zeros_like(q_bias_mu)
    out_m = bnn_conv2d(x, q_weight_mu, q_weight_sig, q_bias_mu, q_bias_sig,
                       zw, zb, stride, padding)
    out_m = jax.block_until_ready(out_m)
    assert jnp.allclose(out_m, reference(zw, zb), atol=2e-2, rtol=2e-2)

    # Strict-f32 path (flag-gated): matches the XLA reference tightly.
    out_f = bnn_conv2d(x, q_weight_mu, q_weight_sig, q_bias_mu, q_bias_sig,
                       w_noise, b_noise, stride, padding,
                       compute_dtype=jnp.float32)
    out_f = jax.block_until_ready(out_f)
    assert jnp.allclose(out_f, reference(w_noise, b_noise), atol=1e-4, rtol=1e-4)

    print("KERNEL_OK")
</pallas_src>

<mosaic_0001>
module attributes {stable_mosaic.version = 11 : i64} {
  func.func @_sample_params_kernel(%arg0: i32, %arg1: memref<36x128xf32, #tpu.memory_space<vmem>>, %arg2: memref<36x128xf32, #tpu.memory_space<vmem>>, %arg3: memref<36x128xf32, #tpu.memory_space<vmem>>, %arg4: memref<1x128xf32, #tpu.memory_space<vmem>>, %arg5: memref<1x128xf32, #tpu.memory_space<vmem>>, %arg6: memref<1x128xf32, #tpu.memory_space<vmem>>, %arg7: memref<36x128xbf16, #tpu.memory_space<vmem>>, %arg8: memref<1x128xf32, #tpu.memory_space<vmem>>) attributes {dimension_semantics = [#tpu.dimension_semantics<parallel>], iteration_bounds = array<i64: 1>, scalar_prefetch = 0 : i64, scratch_operands = 0 : i64, tpu.core_type = #tpu.core_type<tc>, window_params = [{transform_indices = @transform_0, window_bounds = array<i64: 36, 128>}, {transform_indices = @transform_1, window_bounds = array<i64: 36, 128>}, {transform_indices = @transform_2, window_bounds = array<i64: 36, 128>}, {transform_indices = @transform_3, window_bounds = array<i64: 1, 128>}, {transform_indices = @transform_4, window_bounds = array<i64: 1, 128>}, {transform_indices = @transform_5, window_bounds = array<i64: 1, 128>}, {transform_indices = @transform_6, window_bounds = array<i64: 36, 128>}, {transform_indices = @transform_7, window_bounds = array<i64: 1, 128>}]} {
    %c0 = arith.constant 0 : index
    %c0_0 = arith.constant 0 : index
    %0 = vector.load %arg1[%c0, %c0_0] : memref<36x128xf32, #tpu.memory_space<vmem>>, vector<36x128xf32>
    %c0_1 = arith.constant 0 : index
    %c0_2 = arith.constant 0 : index
    %1 = vector.load %arg2[%c0_1, %c0_2] : memref<36x128xf32, #tpu.memory_space<vmem>>, vector<36x128xf32>
    %cst = arith.constant 0.000000e+00 : f32
    %2 = vector.broadcast %cst : f32 to vector<36x128xf32>
    %3 = arith.maximumf %1, %2 : vector<36x128xf32>
    %4 = vector.broadcast %cst : f32 to vector<36x128xf32>
    %5 = arith.subf %1, %4 : vector<36x128xf32>
    %6 = arith.cmpf one, %5, %5 : vector<36x128xf32>
    %7 = vector.broadcast %cst : f32 to vector<36x128xf32>
    %8 = arith.addf %1, %7 : vector<36x128xf32>
    %9 = math.absf %5 : vector<36x128xf32>
    %cst_3 = arith.constant 0.000000e+00 : f32
    %10 = vector.broadcast %cst_3 : f32 to vector<36x128xf32>
    %11 = arith.subf %10, %9 : vector<36x128xf32>
    %12 = math.exp %11 : vector<36x128xf32>
    %13 = math.log1p %12 : vector<36x128xf32>
    %14 = arith.addf %3, %13 : vector<36x128xf32>
    %15 = arith.select %6, %8, %14 : vector<36x128xi1>, vector<36x128xf32>
    %c0_4 = arith.constant 0 : index
    %c0_5 = arith.constant 0 : index
    %16 = vector.load %arg3[%c0_4, %c0_5] : memref<36x128xf32, #tpu.memory_space<vmem>>, vector<36x128xf32>
    %17 = arith.mulf %15, %16 : vector<36x128xf32>
    %18 = arith.addf %0, %17 : vector<36x128xf32>
    %19 = arith.truncf %18 : vector<36x128xf32> to vector<36x128xbf16>
    %c0_6 = arith.constant 0 : index
    %c0_7 = arith.constant 0 : index
    %20 = vector.load %arg7[%c0_6, %c0_7] : memref<36x128xbf16, #tpu.memory_space<vmem>>, vector<36x128xbf16>
    tpu.vector_store %arg7[%c0_6, %c0_7], %19 {strides = array<i32>} : memref<36x128xbf16, #tpu.memory_space<vmem>>, vector<36x128xbf16>,
    %c0_8 = arith.constant 0 : index
    %c0_9 = arith.constant 0 : index
    %21 = vector.load %arg4[%c0_8, %c0_9] : memref<1x128xf32, #tpu.memory_space<vmem>>, vector<1x128xf32>
    %c0_10 = arith.constant 0 : index
    %c0_11 = arith.constant 0 : index
    %22 = vector.load %arg5[%c0_10, %c0_11] : memref<1x128xf32, #tpu.memory_space<vmem>>, vector<1x128xf32>
    %cst_12 = arith.constant 0.000000e+00 : f32
    %23 = vector.broadcast %cst_12 : f32 to vector<1x128xf32>
    %24 = arith.maximumf %22, %23 : vector<1x128xf32>
    %25 = vector.broadcast %cst_12 : f32 to vector<1x128xf32>
    %26 = arith.subf %22, %25 : vector<1x128xf32>
    %27 = arith.cmpf one, %26, %26 : vector<1x128xf32>
    %28 = vector.broadcast %cst_12 : f32 to vector<1x128xf32>
    %29 = arith.addf %22, %28 : vector<1x128xf32>
    %30 = math.absf %26 : vector<1x128xf32>
    %cst_13 = arith.constant 0.000000e+00 : f32
    %31 = vector.broadcast %cst_13 : f32 to vector<1x128xf32>
    %32 = arith.subf %31, %30 : vector<1x128xf32>
    %33 = math.exp %32 : vector<1x128xf32>
    %34 = math.log1p %33 : vector<1x128xf32>
    %35 = arith.addf %24, %34 : vector<1x128xf32>
    %36 = arith.select %27, %29, %35 : vector<1x128xi1>, vector<1x128xf32>
    %c0_14 = arith.constant 0 : index
    %c0_15 = arith.constant 0 : index
    %37 = vector.load %arg6[%c0_14, %c0_15] : memref<1x128xf32, #tpu.memory_space<vmem>>, vector<1x128xf32>
    %38 = arith.mulf %36, %37 : vector<1x128xf32>
    %39 = arith.addf %21, %38 : vector<1x128xf32>
    %c0_16 = arith.constant 0 : index
    %c0_17 = arith.constant 0 : index
    %40 = vector.load %arg8[%c0_16, %c0_17] : memref<1x128xf32, #tpu.memory_space<vmem>>, vector<1x128xf32>
    tpu.vector_store %arg8[%c0_16, %c0_17], %39 {strides = array<i32>} : memref<1x128xf32, #tpu.memory_space<vmem>>, vector<1x128xf32>,
    return
  }
  func.func @transform_0(%arg0: i32) -> (i32, i32) {
    %c0_i32 = arith.constant 0 : i32
    %c0_i32_0 = arith.constant 0 : i32
    return %c0_i32, %arg0 : i32, i32
  }
  func.func @transform_1(%arg0: i32) -> (i32, i32) {
    %c0_i32 = arith.constant 0 : i32
    %c0_i32_0 = arith.constant 0 : i32
    return %c0_i32, %arg0 : i32, i32
  }
  func.func @transform_2(%arg0: i32) -> (i32, i32) {
    %c0_i32 = arith.constant 0 : i32
    %c0_i32_0 = arith.constant 0 : i32
    return %c0_i32, %arg0 : i32, i32
  }
  func.func @transform_3(%arg0: i32) -> (i32, i32) {
    %c0_i32 = arith.constant 0 : i32
    %c0_i32_0 = arith.constant 0 : i32
    return %c0_i32, %arg0 : i32, i32
  }
  func.func @transform_4(%arg0: i32) -> (i32, i32) {
    %c0_i32 = arith.constant 0 : i32
    %c0_i32_0 = arith.constant 0 : i32
    return %c0_i32, %arg0 : i32, i32
  }
  func.func @transform_5(%arg0: i32) -> (i32, i32) {
    %c0_i32 = arith.constant 0 : i32
    %c0_i32_0 = arith.constant 0 : i32
    return %c0_i32, %arg0 : i32, i32
  }
  func.func @transform_6(%arg0: i32) -> (i32, i32) {
    %c0_i32 = arith.constant 0 : i32
    %c0_i32_0 = arith.constant 0 : i32
    return %c0_i32, %arg0 : i32, i32
  }
  func.func @transform_7(%arg0: i32) -> (i32, i32) {
    %c0_i32 = arith.constant 0 : i32
    %c0_i32_0 = arith.constant 0 : i32
    return %c0_i32, %arg0 : i32, i32
  }
}

</mosaic_0001>

<bundles_post_ra>
// kernel: tpu_custom_call.1
= control target key start
LH: loop header
LB: loop body
LE: loop exit
PB: predicated region body
PF: predicated region fallthrough
CT: control target
= control target key end

     0   :  { %13 = vsyncpa [#allocation3], 0  ;;  %s678_s0 = inlined_call_operand.hbm [shape: f32[36,128], index: 0, kind: input, shape index: {}]   ;;  %s679_s1 = inlined_call_operand.hbm [shape: f32[36,128], index: 1, kind: input, shape index: {}]   ;;  %s680_s2 = inlined_call_operand.hbm [shape: f32[36,128], index: 2, kind: input, shape index: {}]   ;;  %s681_s3 = inlined_call_operand.vmem [shape: f32[1,128], index: 3, kind: input, shape index: {}]   ;;  %s682_s4 = inlined_call_operand.vmem [shape: f32[1,128], index: 4, kind: input, shape index: {}]   ;;  %s683_s5 = inlined_call_operand.vmem [shape: f32[1,128], index: 5, kind: input, shape index: {}]   ;;  %s684_s6 = inlined_call_operand.hbm [shape: bf16[36,128], index: 6, kind: output, shape index: {0}]   ;;  %s685_s7 = inlined_call_operand.hbm [shape: f32[1,128], index: 7, kind: output, shape index: {1}]  }
   0x1   :  { %14 = vsyncpa [#allocation6], 0 }
   0x2   :  { %15 = vsyncpa [#allocation4], 0 }
   0x3   :  { %16 = vsyncpa [#allocation10], 0  ;;  %s437_s24 = smov [#allocation5]   ;;  %s438_s26 = smov [#allocation2]  }
   0x4   :  { %s34_s25 = sshll.u32 %s437_s24, 4  ;;  %s22_s27 = sshll.u32 %s438_s26, 4  ;;  %s35_s25 = int_to_ptr.vmem [resolvable:$true] %s34_s25  ;;  %s486_s27 = int_to_ptr.vmem [resolvable:$true] %s22_s27 }
   0x5   :  { %s319_s30 = scalar_lea.hbm %s679_s1, 640 }
   0x6   :  { %p320_p0 = scmp.ne.s32.totalorder %s679_s1, %s319_s30  ;;  %p323_p1 = scmp.lt.u32.totalorder %s319_s30, %s679_s1 }
   0x8   :  { %p325_p2 = pnand %p323_p1, %p320_p0 }
   0xa   :  { %328 = shalt.err (!%p325_p2)
}
   0xb   :  { %s329_s12 = scalar_lea.vmem %s35_s25, 640  ;;  %p334_p4 = scmp.lt.s32.totalorder %s35_s25, %s35_s25 }
   0xc   :  { %p330_p3 = scmp.ne.s32.totalorder %s35_s25, %s329_s12  ;;  %p335_p5 = scmp.lt.s32.totalorder %s329_s12, %s329_s12 }
   0xe   :  { %p336_p6 = por %p335_p5, %p334_p4 }
  0x10   :  { %p337_p7 = pnand %p336_p6, %p330_p3 }
  0x12   :  { %340 = shalt.err (!%p337_p7)
}
  0x13   :  { %s439_s13 = smov 128   ;;  %s440_s14 = smov 8  }
  0x14   :  { %40 = dma.hbm_to_vmem [thread:$0]  %s679_s1, 640, %s35_s25, [#allocation6], %s439_s13, %s439_s13, %s440_s14  }
  0x15   :  { %s341_s19 = scalar_lea.hbm %s678_s0, 640 }
  0x16   :  { %p342_p8 = scmp.ne.s32.totalorder %s678_s0, %s341_s19  ;;  %p345_p9 = scmp.lt.u32.totalorder %s341_s19, %s678_s0 }
  0x18   :  { %p347_p10 = pnand %p345_p9, %p342_p8 }
  0x1a   :  { %350 = shalt.err (!%p347_p10)
}
  0x1b   :  { %s351_s24 = scalar_lea.vmem %s486_s27, 640  ;;  %p356_p12 = scmp.lt.s32.totalorder %s486_s27, %s486_s27 }
  0x1c   :  { %p352_p11 = scmp.ne.s32.totalorder %s486_s27, %s351_s24  ;;  %p357_p13 = scmp.lt.s32.totalorder %s351_s24, %s351_s24 }
  0x1e   :  { %p358_p0 = por %p357_p13, %p356_p12 }
  0x20   :  { %p359_p1 = pnand %p358_p0, %p352_p11 }
  0x22   :  { %362 = shalt.err (!%p359_p1)
}
  0x23   :  { %28 = dma.hbm_to_vmem [thread:$0]  %s678_s0, 640, %s486_s27, [#allocation3], %s439_s13, %s439_s13, %s440_s14  }
  0x24   :  { %s441_s26 = smov [#allocation7]   ;;  %s363_s8 = scalar_lea.hbm %s680_s2, 640 }
  0x25   :  { %s46_s28 = sshll.u32 %s441_s26, 4  ;;  %p364_p2 = scmp.ne.s32.totalorder %s680_s2, %s363_s8  ;;  %s47_s28 = int_to_ptr.vmem [resolvable:$true] %s46_s28 }
  0x26   :  { %p367_p3 = scmp.lt.u32.totalorder %s363_s8, %s680_s2 }
  0x28   :  { %p369_p4 = pnand %p367_p3, %p364_p2 }
  0x2a   :  { %372 = shalt.err (!%p369_p4)
}
  0x2b   :  { %s373_s15 = scalar_lea.vmem %s47_s28, 640  ;;  %p378_p6 = scmp.lt.s32.totalorder %s47_s28, %s47_s28 }
  0x2c   :  { %p374_p5 = scmp.ne.s32.totalorder %s47_s28, %s373_s15  ;;  %p379_p7 = scmp.lt.s32.totalorder %s373_s15, %s373_s15 }
  0x2e   :  { %p380_p8 = por %p379_p7, %p378_p6 }
  0x30   :  { %p381_p9 = pnand %p380_p8, %p374_p5 }
  0x32   :  { %384 = shalt.err (!%p381_p9)
}
  0x33   :  { %52 = dma.hbm_to_vmem [thread:$0]  %s680_s2, 640, %s47_s28, [#allocation6], %s439_s13, %s439_s13, %s440_s14  }
  0x34   :  { %429 = dma.done.wait [#allocation3], 640  }
  0x35   :  { %430 = vsyncadd [#allocation3], 4294966656 }
  0x36   :  { %431 = dma.done.wait [#allocation6], 1280  }
  0x37   :  { %432 = vsyncadd [#allocation6], 4294966016  ;;  %v538_v0 = vld [vmem:[#allocation5] sm:$0xff]  ;;  %v540_v1 = vld [vmem:[#allocation5 + $0x8] sm:$0xff]  ;;  %s442_s16 = smov [#allocation8]   ;;  %s443_s20 = smov [#allocation9]  }
  0x38   :  { %v93_v2 = vand.u32 2147483647, %v538_v0  ;;  %v94_v3 = vand.u32 2147483647, %v540_v1  ;;  %v544_v4 = vld [vmem:[#allocation5 + $0x10] sm:$0xff]  ;;  %v546_v6 = vld [vmem:[#allocation5 + $0x18] sm:$0xff]  ;;  %vm83_vm0 = vcmp.ne.f32.partialorder %v538_v0, %v538_v0  ;;  %vm84_vm1 = vcmp.ne.f32.partialorder %v540_v1, %v540_v1 }
  0x39   :  { %v95_v7 = vand.u32 2147483647, %v544_v4  ;;  %v96_v9 = vand.u32 2147483647, %v546_v6  ;;  %v550_v14 = vld [vmem:[#allocation5 + $0x20] sm:$0xf]  ;;  %vm85_vm2 = vcmp.ne.f32.partialorder %v544_v4, %v544_v4  ;;  %vm86_vm3 = vcmp.ne.f32.partialorder %v546_v6, %v546_v6 }
  0x3a   :  { %v98_v5 = vsub.f32 0.0, %v93_v2  ;;  %v99_v8 = vsub.f32 0.0, %v94_v3  ;;  %v97_v17 = vand.u32 2147483647, %v550_v14  ;;  %v556_v18 = vld [vmem:[%s682_s4] sm:$0x1]  ;;  %vm87_vm8 = vcmp.ne.f32.partialorder %v550_v14, %v550_v14 }
  0x3b   :  { %v100_v11 = vsub.f32 0.0, %v95_v7  ;;  %v101_v13 = vsub.f32 0.0, %v96_v9  ;;  %v214_v20 = vand.u32 2147483647, %v556_v18  ;;  %v78_v36 = vmax.f32 %v538_v0, 0.0  ;;  %s238_s17 = sshll.u32 %s442_s16, 4  ;;  %s239_s17 = int_to_ptr.vmem [resolvable:$true] %s238_s17 }
  0x3c   :  { %v103_v10 = vmul.f32 1.442695, %v98_v5  ;;  %v105_v12 = vmul.f32 1.442695, %v99_v8  ;;  %v102_v19 = vsub.f32 0.0, %v97_v17  ;;  %v79_v40 = vmax.f32 %v540_v1, 0.0  ;;  %p390_p11 = scmp.lt.s32.totalorder %s239_s17, %s239_s17 }
  0x3d   :  { %v107_v15 = vmul.f32 1.442695, %v100_v11  ;;  %v109_v16 = vmul.f32 1.442695, %v101_v13  ;;  %v215_v22 = vsub.f32 0.0, %v214_v20  ;;  %v80_v45 = vmax.f32 %v544_v4, 0.0 }
  0x3e   :  { %295 = vpow2.f32 %v103_v10  ;;  %v111_v21 = vmul.f32 1.442695, %v102_v19  ;;  %v81_v51 = vmax.f32 %v546_v6, 0.0  ;;  %v82_v3 = vmax.f32 %v550_v14, 0.0  ;;  %v169_v19 = vld [vmem:[#allocation7 + $0x8] sm:$0xff]  ;;  %s251_s21 = sshll.u32 %s443_s20, 4  ;;  %s646_s21 = int_to_ptr.vmem [resolvable:$true] %s251_s21 }
  0x3f   :  { %297 = vpow2.f32 %v105_v12  ;;  %v216_v23 = vmul.f32 1.442695, %v215_v22  ;;  %vm212_vm11 = vcmp.ne.f32.partialorder %v556_v18, %v556_v18 }
  0x40   :  { %299 = vpow2.f32 %v107_v15  ;;  %v168_v15 = vld [vmem:[#allocation7] sm:$0xff] }
  0x41   :  { %301 = vpow2.f32 %v109_v16 }
  0x42   :  { %303 = vpow2.f32 %v111_v21 }
  0x43   :  { %305 = vpow2.f32 %v216_v23  ;;  %v68_v23 = vld [vmem:[#allocation2] sm:$0xff] }
  0x48   :  { %v296_v24 = vpop.eup %295 }
  0x49   :  { %v298_v25 = vpop.eup %297  ;;  %v113_v26 = vadd.f32 1.0, %v296_v24  ;;  %v116_v31 = vmul.f32 -0.5, %v296_v24  ;;  %v119_v41 = vand.u32 2147483647, %v296_v24 }
  0x4a   :  { %v300_v27 = vpop.eup %299  ;;  %v122_v28 = vadd.f32 1.0, %v298_v25  ;;  %v125_v32 = vmul.f32 -0.5, %v298_v25  ;;  %v128_v44 = vand.u32 2147483647, %v298_v25 }
  0x4b   :  { %v302_v29 = vpop.eup %301  ;;  %307 = vlog2.f32 %v113_v26  ;;  %v131_v30 = vadd.f32 1.0, %v300_v27  ;;  %v134_v34 = vmul.f32 -0.5, %v300_v27  ;;  %v117_v37 = vadd.f32 1.0, %v116_v31  ;;  %v170_v26 = vld [vmem:[#allocation7 + $0x10] sm:$0xff] }
  0x4c   :  { %309 = vlog2.f32 %v122_v28  ;;  %v140_v33 = vadd.f32 1.0, %v302_v29  ;;  %v559_v35 = vpop.eup %303  ;;  %v143_v38 = vmul.f32 -0.5, %v302_v29  ;;  %v126_v42 = vadd.f32 1.0, %v125_v32 }
  0x4d   :  { %311 = vlog2.f32 %v131_v30  ;;  %v149_v39 = vadd.f32 1.0, %v559_v35  ;;  %v568_v43 = vpop.eup %305  ;;  %v135_v46 = vadd.f32 1.0, %v134_v34  ;;  %v137_v47 = vand.u32 2147483647, %v300_v27  ;;  %v69_v30 = vld [vmem:[#allocation2 + $0x8] sm:$0xff] }
  0x4e   :  { %313 = vlog2.f32 %v140_v33  ;;  %v152_v48 = vmul.f32 -0.5, %v559_v35  ;;  %v218_v49 = vadd.f32 1.0, %v568_v43  ;;  %v118_v50 = vmul.f32 %v296_v24, %v117_v37 }
  0x4f   :  { %315 = vlog2.f32 %v149_v39  ;;  %v144_v52 = vadd.f32 1.0, %v143_v38  ;;  %vm578_vm4 = vcmp.lt.f32.partialorder %v119_v41, 0.0004427343  ;;  %v127_v55 = vmul.f32 %v298_v25, %v126_v42  ;;  %v171_v38 = vld [vmem:[#allocation7 + $0x18] sm:$0xff] }
  0x50   :  { %v146_v56 = vand.u32 2147483647, %v302_v29  ;;  %317 = vlog2.f32 %v218_v49  ;;  %vm582_vm5 = vcmp.lt.f32.partialorder %v128_v44, 0.0004427343  ;;  %v136_v60 = vmul.f32 %v300_v27, %v135_v46  ;;  %v71_v46 = vld [vmem:[#allocation2 + $0x18] sm:$0xff] }
  0x51   :  { %v221_v61 = vmul.f32 -0.5, %v568_v43  ;;  %vm587_vm6 = vcmp.lt.f32.partialorder %v137_v47, 0.0004427343  ;;  %v153_v5 = vadd.f32 1.0, %v152_v48  ;;  %v145_v9 = vmul.f32 %v302_v29, %v144_v52 }
  0x52   :  { %v155_v10 = vand.u32 2147483647, %v559_v35  ;;  %vm597_vm7 = vcmp.lt.f32.partialorder %v146_v56, 0.0004427343  ;;  %v224_v28 = vand.u32 2147483647, %v568_v43 }
  0x53   :  { %v222_v22 = vadd.f32 1.0, %v221_v61  ;;  %v154_v27 = vmul.f32 %v559_v35, %v153_v5  ;;  %v211_v41 = vmax.f32 %v556_v18, 0.0  ;;  %v209_v61 = vld [vmem:[%s681_s3] sm:$0x1] }
  0x54   :  { %vm617_vm9 = vcmp.lt.f32.partialorder %v155_v10, 0.0004427343  ;;  %vm225_vm10 = vcmp.lt.f32.partialorder %v224_v28, 0.0004427343 }
  0x55   :  { %v308_v53 = vpop.eup %307  ;;  %v223_v42 = vmul.f32 %v568_v43, %v222_v22  ;;  %v72_v43 = vld [vmem:[#allocation2 + $0x20] sm:$0xf] }
  0x56   :  { %v310_v57 = vpop.eup %309  ;;  %v115_v58 = vmul.f32 0.6931472, %v308_v53 }
  0x57   :  { %v312_v62 = vpop.eup %311  ;;  %v124_v63 = vmul.f32 0.6931472, %v310_v57 }
  0x58   :  { %v121_v7 = vsel %vm578_vm4, %v118_v50, %v115_v58  ;;  %v133_v8 = vmul.f32 0.6931472, %v312_v62  ;;  %v314_v11 = vpop.eup %313  ;;  %v229_v58 = vld [vmem:[%s683_s5] sm:$0x1]  ;;  %s385_s5 = scalar_lea.vmem %s239_s17, 320 }
  0x59   :  { %v130_v12 = vsel %vm582_vm5, %v127_v55, %v124_v63  ;;  %v158_v13 = vadd.f32 %v121_v7, %v78_v36  ;;  %v142_v21 = vmul.f32 0.6931472, %v314_v11  ;;  %v316_v29 = vpop.eup %315  ;;  %v70_v36 = vld [vmem:[#allocation2 + $0x10] sm:$0xff]  ;;  %p386_p10 = scmp.ne.s32.totalorder %s239_s17, %s385_s5  ;;  %p391_p12 = scmp.lt.s32.totalorder %s385_s5, %s385_s5 }
  0x5a   :  { %v159_v17 = vadd.f32 %v130_v12, %v79_v40  ;;  %v139_v20 = vsel %vm587_vm6, %v136_v60, %v133_v8  ;;  %v151_v39 = vmul.f32 0.6931472, %v316_v29  ;;  %v318_v44 = vpop.eup %317 }
  0x5b   :  { %v163_v24 = vsel %vm83_vm0, %v538_v0, %v158_v13  ;;  %v160_v25 = vadd.f32 %v139_v20, %v80_v45  ;;  %v148_v33 = vsel %vm597_vm7, %v145_v9, %v142_v21  ;;  %v220_v52 = vmul.f32 0.6931472, %v318_v44  ;;  %p392_p13 = por %p391_p12, %p390_p11 }
  0x5c   :  { %v164_v31 = vsel %vm84_vm1, %v540_v1, %v159_v17  ;;  %v173_v32 = vmul.f32 %v168_v15, %v163_v24  ;;  %v161_v35 = vadd.f32 %v148_v33, %v81_v51  ;;  %v157_v48 = vsel %vm617_vm9, %v154_v27, %v151_v39  ;;  %v172_v51 = vld [vmem:[#allocation7 + $0x20] sm:$0xf] }
  0x5d   :  { %v174_v0 = vmul.f32 %v169_v19, %v164_v31  ;;  %v165_v37 = vsel %vm85_vm2, %v544_v4, %v160_v25  ;;  %v162_v50 = vadd.f32 %v157_v48, %v82_v3  ;;  %p393_p0 = pnand %p392_p13, %p386_p10 }
  0x5e   :  { %v178_v40 = vadd.f32 %v173_v32, %v68_v23  ;;  %v175_v1 = vmul.f32 %v170_v26, %v165_v37  ;;  %v166_v47 = vsel %vm86_vm3, %v546_v6, %v161_v35  ;;  %v226_v6 = vsel %vm225_vm10, %v223_v42, %v220_v52 }
  0x5f   :  { %v179_v45 = vadd.f32 %v174_v0, %v69_v30  ;;  %v176_v4 = vmul.f32 %v171_v38, %v166_v47  ;;  %v167_v55 = vsel %vm87_vm8, %v550_v14, %v162_v50  ;;  %v227_v57 = vadd.f32 %v226_v6, %v211_v41 }
  0x60   :  { %v180_v49 = vadd.f32 %v175_v1, %v70_v36  ;;  %v177_v56 = vmul.f32 %v172_v51, %v167_v55 }
  0x61   :  { %v278_v53 = vpack.c.bf16 %v179_v45, %v178_v40  ;;  %v181_v54 = vadd.f32 %v176_v4, %v71_v46  ;;  %v228_v14 = vsel %vm212_vm11, %v556_v18, %v227_v57 }
  0x62   :  { %v182_v60 = vadd.f32 %v177_v56, %v72_v43  ;;  %v230_v62 = vmul.f32 %v229_v58, %v228_v14 }
  0x63   :  { %279 = vst [vmem:[#allocation8] sm:$0xff] %v278_v53   ;;  %v283_v59 = vpack.c.bf16 %v181_v54, %v180_v49 }
  0x64   :  { %v274_v63 = vpack.c.bf16 %v182_v60, %v182_v60  ;;  %v231_v2 = vadd.f32 %v230_v62, %v209_v61 }
  0x65   :  { %285 = vst [vmem:[#allocation8 + $0x8] sm:$0xff] %v283_v59  }
  0x66   :  { %208 = vst [vmem:[#allocation8 + $0x10] sm:$0x3] %v274_v63  ;;  %232 = vst [vmem:[#allocation9] sm:$0x1] %v231_v2 }
  0x67   :  { %396 = shalt.err (!%p393_p0)
}
  0x68   :  { %s397_s23 = scalar_lea.hbm %s684_s6, 320 }
  0x69   :  { %p398_p1 = scmp.ne.s32.totalorder %s684_s6, %s397_s23  ;;  %p401_p2 = scmp.lt.u32.totalorder %s397_s23, %s684_s6 }
  0x6b   :  { %p403_p3 = pnand %p401_p2, %p398_p1 }
  0x6d   :  { %406 = shalt.err (!%p403_p3)
}
  0x6e   :  { %s444_s28 = smov 64   ;;  %s445_s29 = smov 4  }
  0x6f   :  { %244 = dma.vmem_to_hbm [thread:$0]  %s239_s17, 320, %s684_s6, [#allocation4], %s444_s28, %s444_s28, %s445_s29  }
  0x70   :  { %s407_s9 = scalar_lea.vmem %s646_s21, 16  ;;  %s411_s10 = scalar_lea.vmem %s646_s21, 32 }
  0x71   :  { %p408_p4 = scmp.ne.s32.totalorder %s646_s21, %s407_s9  ;;  %p412_p5 = scmp.lt.s32.totalorder %s646_s21, %s646_s21 }
  0x72   :  { %p413_p6 = scmp.lt.s32.totalorder %s411_s10, %s407_s9 }
  0x74   :  { %p414_p7 = por %p413_p6, %p412_p5 }
  0x76   :  { %p415_p8 = pnand %p414_p7, %p408_p4 }
  0x78   :  { %418 = shalt.err (!%p415_p8)
}
  0x79   :  { %s419_s15 = scalar_lea.hbm %s685_s7, 16 }
  0x7a   :  { %p420_p9 = scmp.ne.s32.totalorder %s685_s7, %s419_s15  ;;  %p423_p10 = scmp.lt.u32.totalorder %s419_s15, %s685_s7 }
  0x7c   :  { %p425_p11 = pnand %p423_p10, %p420_p9 }
  0x7e   :  { %428 = shalt.err (!%p425_p11)
}
  0x7f   :  { %254 = dma.vmem_to_hbm [thread:$0]  %s646_s21, 16, %s685_s7, [#allocation10]  }
  0x80   :  { %433 = dma.done.wait [#allocation4], 320  }
  0x81   :  { %434 = vsyncadd [#allocation4], 4294966976 }
  0x82   :  { %435 = dma.done.wait [#allocation10], 16  }
  0x83   :  { %436 = vsyncadd [#allocation10], 4294967280 }
  0x84   :  { %261 = vsyncpa [#allocation3], 1 }
  0x85   :  { %262 = vsyncpa [#allocation6], 1 }
  0x86   :  { %263 = vsyncpa [#allocation4], 1 }
  0x87   :  { %264 = vsyncpa [#allocation10], 1 }

</bundles_post_ra>
